<compile_context>
chip_gen: v5e
topology: v5e:2x2
jax: 0.10.0
libtpu: 0.0.40
codegen_flags: <defaults>
</compile_context>

<pallas_src>
import jax
import jax.numpy as jnp
from jax.experimental import pallas as pl
from jax.experimental.pallas import tpu as pltpu


def _round_up(x, m):
    return ((x + m - 1) // m) * m


def _pad2d(a, shape, dtype):
    out = jnp.zeros(shape, dtype)
    return out.at[: a.shape[0], : a.shape[1]].set(a.astype(dtype))


# ---------------------------------------------------------------------------
# Kernel: one batch tile -> fused Linear/ReLU x3 (MXU matmuls, f32 accum).
# ---------------------------------------------------------------------------
def generator_kernel(z_ref, w1_ref, b1_ref, w2_ref, b2_ref, w3_ref, b3_ref,
                     out_ref):
    # Cast the streamed activations to bf16 in-kernel; weights arrive
    # pre-cast.  All accumulation / bias / ReLU stays in f32.
    z = z_ref[...].astype(w1_ref.dtype)

    # main_mlp: Linear -> ReLU -> Linear -> ReLU
    h = jnp.dot(z, w1_ref[...], preferred_element_type=jnp.float32)
    h = jnp.maximum(h + b1_ref[...], 0.0)

    h = jnp.dot(h.astype(w2_ref.dtype), w2_ref[...],
                preferred_element_type=jnp.float32)
    h = jnp.maximum(h + b2_ref[...], 0.0)          # latent (tm, hid_p)

    # lat_long_mlp: Linear -> ReLU
    o = jnp.dot(h.astype(w3_ref.dtype), w3_ref[...],
                preferred_element_type=jnp.float32)
    o = jnp.maximum(o + b3_ref[...], 0.0)

    out_ref[...] = o.astype(out_ref.dtype)


# ---------------------------------------------------------------------------
# One-time parameter preparation (hoisted out of the per-call path).
# ---------------------------------------------------------------------------
def prepare_params(params):
    """Pad + cast f32, PyTorch-equivalent params ONCE; reuse across calls.

    Weights -> bf16 (MXU inputs), biases -> f32.  Feature dims are padded to
    128, or 256 when large enough that the 256-wide MXU of v6e/v7x benefits
    from full-width tiles.  Zero padding is semantically neutral: padded
    features stay exactly 0 through matmul + bias + ReLU.
    """
    w1, b1, w2, b2, w3, b3 = params
    in_dim, hid = w1.shape
    out_dim = w3.shape[1]

    hid_align = 256 if hid >= 512 else 128
    out_align = 256 if out_dim >= 512 else 128
    hid_p = _round_up(hid, hid_align)
    out_p = _round_up(out_dim, out_align)

    padded = (
        _pad2d(w1, (in_dim, hid_p), jnp.bfloat16),
        _pad2d(b1, (1, hid_p), jnp.float32),
        _pad2d(w2, (hid_p, hid_p), jnp.bfloat16),
        _pad2d(b2, (1, hid_p), jnp.float32),
        _pad2d(w3, (hid_p, out_p), jnp.bfloat16),
        _pad2d(b3, (1, out_p), jnp.float32),
    )
    return padded, out_dim


def _pick_tm(B):
    if B <= 8:
        return B                       # block == full batch dim (legal), 1 step
    tm = min(512, _round_up(B, 8))     # large tiles amortize per-step overhead
    half = _round_up((B + 1) // 2, 8)  # >= 2 grid steps -> both v7x TCs busy,
    return max(8, min(tm, half))       # and the tail tile isn't ~all padding


def _pick_vmem_limit(weight_bytes, tm, in_dim, hid_p, out_p, out_itemsize,
                     single_buffer_weights):
    phys = 64 << 20                    # conservative default (v7x per-TC VMEM)
    try:
        phys = int(pltpu.get_tpu_info().vmem_capacity_bytes)
    except Exception:
        pass
    w_mult = 1 if single_buffer_weights else 2
    stream = 2 * tm * (in_dim * 4 + out_p * out_itemsize)   # dbl-buffered z/out
    acts = tm * (hid_p * 6 + out_p * 4)                     # live h / o values
    needed = w_mult * weight_bytes + stream + acts + (8 << 20)
    # Cap below physical VMEM: ~48 MiB on v7x (64 MiB/TC), up to ~100 MiB on
    # v5e/v6e (128 MiB).  Never go below the 32 MiB scoped default.
    return int(max(32 << 20, min(needed, phys - (16 << 20), 100 << 20)))


# ---------------------------------------------------------------------------
# Wrapper: batch-tiled pallas_call over pre-padded params.
# ---------------------------------------------------------------------------
def generator_forward(z, padded_params, out_dim, *, tm=None,
                      out_dtype=jnp.float32):
    """Fused Generator forward.  `padded_params` from `prepare_params`.

    `out_dtype=jnp.bfloat16` halves output HBM writeback if the consumer
    tolerates it (relevant when B is large and streaming dominates).
    """
    w1p, b1p, w2p, b2p, w3p, b3p = padded_params
    B, in_dim = z.shape
    assert w1p.shape[0] == in_dim
    hid_p = w1p.shape[1]
    out_p = w3p.shape[1]

    if tm is None:
        tm = _pick_tm(B)
    B_p = _round_up(B, tm)
    grid = (B_p // tm,)

    # Only the batch dim is ever padded (and only when B % tm != 0); z's
    # feature dim stays natural and its bf16 cast happens in-kernel.
    z_in = z if B_p == B else jnp.zeros((B_p, in_dim), z.dtype).at[:B].set(z)

    weights = (w1p, b1p, w2p, b2p, w3p, b3p)
    weight_bytes = sum(int(a.size) * a.dtype.itemsize for a in weights)
    out_itemsize = jnp.dtype(out_dtype).itemsize

    cost = pl.CostEstimate(
        flops=2 * B_p * (in_dim * hid_p + hid_p * hid_p + hid_p * out_p),
        transcendentals=0,
        bytes_accessed=int(z_in.size) * z_in.dtype.itemsize + weight_bytes
        + B_p * out_p * out_itemsize,
    )

    def run(single_buffer_weights):
        if single_buffer_weights:
            # Constant index_map => weights DMA'd from HBM once per call;
            # single-buffering halves their VMEM footprint (matters on v7x).
            resident = lambda a: pl.BlockSpec(a.shape, lambda i: (0, 0),
                                              pipeline_mode=pl.Buffered(1))
        else:
            resident = lambda a: pl.BlockSpec(a.shape, lambda i: (0, 0))

        vmem_limit = _pick_vmem_limit(weight_bytes, tm, in_dim, hid_p, out_p,
                                      out_itemsize, single_buffer_weights)
        out = pl.pallas_call(
            generator_kernel,
            out_shape=jax.ShapeDtypeStruct((B_p, out_p), out_dtype),
            grid_spec=pltpu.PrefetchScalarGridSpec(
                num_scalar_prefetch=0,
                grid=grid,
                in_specs=[
                    pl.BlockSpec((tm, in_dim), lambda i: (i, 0)),  # z streamed
                    resident(w1p), resident(b1p),
                    resident(w2p), resident(b2p),
                    resident(w3p), resident(b3p),
                ],
                out_specs=pl.BlockSpec((tm, out_p), lambda i: (i, 0)),
            ),
            compiler_params=pltpu.CompilerParams(
                dimension_semantics=("parallel",),   # megacore sharding (v7x)
                vmem_limit_bytes=vmem_limit,
            ),
            cost_estimate=cost,
        )(z_in, *weights)
        return jax.block_until_ready(out)

    # TODO(synk): for very large hidden_dim (resident bf16 weights >~40 MiB,
    # i.e. hid_p >~ 4k) the residency scheme stops fitting v7x VMEM; add a
    # K-tiled "arbitrary" grid axis with an f32 VMEM accumulator instead of
    # holding w2 resident.
    try:
        out_padded = run(single_buffer_weights=True)
    except Exception:
        # pl.Buffered(1) single-buffering of resident inputs may not be
        # supported by this JAX/Mosaic version; fall back to the default
        # double-buffered pipeline (identical semantics, 2x weight VMEM).
        out_padded = run(single_buffer_weights=False)

    if B_p != B or out_p != out_dim:
        return out_padded[:B, :out_dim]
    return out_padded


# ---------------------------------------------------------------------------
# Parameters + references.
# ---------------------------------------------------------------------------
def init_params(key, input_dim, hidden_dim, lat_lon_dim):
    """Deterministic synthetic parameters (shapes match the PyTorch module,
    stored as (in_features, out_features) so the kernel computes x @ W + b)."""
    k1, k2, k3, k4, k5, k6 = jax.random.split(key, 6)
    scale = 0.1
    w1 = scale * jax.random.normal(k1, (input_dim, hidden_dim), jnp.float32)
    b1 = scale * jax.random.normal(k2, (1, hidden_dim), jnp.float32)
    w2 = scale * jax.random.normal(k3, (hidden_dim, hidden_dim), jnp.float32)
    b2 = scale * jax.random.normal(k4, (1, hidden_dim), jnp.float32)
    # lat_long_mlp: Linear(time_steps*lat_dim*lon_dim -> lat_dim*lon_dim)
    w3 = scale * jax.random.normal(k5, (hidden_dim, lat_lon_dim), jnp.float32)
    b3 = scale * jax.random.normal(k6, (1, lat_lon_dim), jnp.float32)
    return (w1, b1, w2, b2, w3, b3)


def reference_forward_f32(z, params):
    """Pure f32 PyTorch-equivalent forward."""
    w1, b1, w2, b2, w3, b3 = params
    h = jnp.maximum(z @ w1 + b1, 0.0)
    h = jnp.maximum(h @ w2 + b2, 0.0)
    return jnp.maximum(h @ w3 + b3, 0.0)


def reference_forward_bf16(z, params):
    """Mirror of the kernel numerics: bf16 matmul inputs, f32 accumulation."""
    w1, b1, w2, b2, w3, b3 = params
    bf = jnp.bfloat16
    h = jnp.dot(z.astype(bf), w1.astype(bf), preferred_element_type=jnp.float32)
    h = jnp.maximum(h + b1, 0.0)
    h = jnp.dot(h.astype(bf), w2.astype(bf), preferred_element_type=jnp.float32)
    h = jnp.maximum(h + b2, 0.0)
    o = jnp.dot(h.astype(bf), w3.astype(bf), preferred_element_type=jnp.float32)
    return jnp.maximum(o + b3, 0.0)


if __name__ == "__main__":
    # Small shapes consistent with the module: hidden_dim must equal
    # time_steps * lat_dim * lon_dim for the PyTorch forward to type-check.
    batch = 2
    input_dim = 16
    time_steps, lat_dim, lon_dim = 2, 4, 4
    hidden_dim = time_steps * lat_dim * lon_dim      # 32
    lat_lon_dim = lat_dim * lon_dim                  # 16

    key = jax.random.PRNGKey(0)
    kz, kz2, kp = jax.random.split(key, 3)
    z = jax.random.normal(kz, (batch, input_dim), jnp.float32)
    params = init_params(kp, input_dim, hidden_dim, lat_lon_dim)

    # One-time pad + cast of the weights (hoisted out of the per-call path).
    padded_params, out_dim = prepare_params(params)

    out = generator_forward(z, padded_params, out_dim)
    out = jax.block_until_ready(out)
    assert out.shape == (batch, lat_lon_dim)

    # Tight check against the kernel's own numerics (bf16 inputs, f32 accum).
    ref_bf16 = reference_forward_bf16(z, params)
    assert jnp.allclose(out, ref_bf16, atol=1e-3, rtol=1e-3)

    # Sanity check against the pure-f32 PyTorch-equivalent forward.
    ref_f32 = reference_forward_f32(z, params)
    assert jnp.allclose(out, ref_f32, atol=5e-2, rtol=5e-2)

    # Second check: batch that exercises the multi-step grid (>=2 "parallel"
    # steps) and the batch-padding / output-slicing path.
    batch2 = 24
    z2 = jax.random.normal(kz2, (batch2, input_dim), jnp.float32)
    out2 = jax.block_until_ready(generator_forward(z2, padded_params, out_dim))
    assert out2.shape == (batch2, lat_lon_dim)
    assert jnp.allclose(out2, reference_forward_bf16(z2, params),
                        atol=1e-3, rtol=1e-3)

    # TODO(synk): the PyTorch forward's `print(latent.shape)` debug print has
    # no in-kernel equivalent and is intentionally omitted.

    print("KERNEL_OK")
</pallas_src>

<mosaic_0001>
module attributes {stable_mosaic.version = 11 : i64} {
  func.func @generator_kernel(%arg0: i32, %arg1: memref<2x16xf32, #tpu.memory_space<vmem>>, %arg2: memref<16x128xbf16, #tpu.memory_space<vmem>>, %arg3: memref<1x128xf32, #tpu.memory_space<vmem>>, %arg4: memref<128x128xbf16, #tpu.memory_space<vmem>>, %arg5: memref<1x128xf32, #tpu.memory_space<vmem>>, %arg6: memref<128x128xbf16, #tpu.memory_space<vmem>>, %arg7: memref<1x128xf32, #tpu.memory_space<vmem>>, %arg8: memref<2x128xf32, #tpu.memory_space<vmem>>) attributes {dimension_semantics = [#tpu.dimension_semantics<parallel>], iteration_bounds = array<i64: 1>, scalar_prefetch = 0 : i64, scratch_operands = 0 : i64, tpu.core_type = #tpu.core_type<tc>, window_params = [{transform_indices = @transform_0, window_bounds = array<i64: 2, 16>}, {pipeline_mode = #tpu.pipeline_mode<synchronous>, transform_indices = @transform_1, window_bounds = array<i64: 16, 128>}, {pipeline_mode = #tpu.pipeline_mode<synchronous>, transform_indices = @transform_2, window_bounds = array<i64: 1, 128>}, {pipeline_mode = #tpu.pipeline_mode<synchronous>, transform_indices = @transform_3, window_bounds = array<i64: 128, 128>}, {pipeline_mode = #tpu.pipeline_mode<synchronous>, transform_indices = @transform_4, window_bounds = array<i64: 1, 128>}, {pipeline_mode = #tpu.pipeline_mode<synchronous>, transform_indices = @transform_5, window_bounds = array<i64: 128, 128>}, {pipeline_mode = #tpu.pipeline_mode<synchronous>, transform_indices = @transform_6, window_bounds = array<i64: 1, 128>}, {transform_indices = @transform_7, window_bounds = array<i64: 2, 128>}]} {
    %c0 = arith.constant 0 : index
    %c0_0 = arith.constant 0 : index
    %0 = vector.load %arg1[%c0, %c0_0] : memref<2x16xf32, #tpu.memory_space<vmem>>, vector<2x16xf32>
    %1 = arith.truncf %0 : vector<2x16xf32> to vector<2x16xbf16>
    %c0_1 = arith.constant 0 : index
    %c0_2 = arith.constant 0 : index
    %2 = vector.load %arg2[%c0_1, %c0_2] : memref<16x128xbf16, #tpu.memory_space<vmem>>, vector<16x128xbf16>
    %cst = arith.constant dense<0.000000e+00> : vector<2x128xf32>
    %3 = tpu.matmul %1, %2, %cst {dimension_numbers = #tpu.dot_dimension_numbers<[1], [0], [0], [1], [0, 0, 1, 1], [], []>} : vector<2x16xbf16>, vector<16x128xbf16>, vector<2x128xf32> -> vector<2x128xf32>
    %c0_3 = arith.constant 0 : index
    %c0_4 = arith.constant 0 : index
    %4 = vector.load %arg3[%c0_3, %c0_4] : memref<1x128xf32, #tpu.memory_space<vmem>>, vector<1x128xf32>
    %5 = vector.broadcast %4 : vector<1x128xf32> to vector<2x128xf32>
    %6 = arith.addf %3, %5 : vector<2x128xf32>
    %cst_5 = arith.constant 0.000000e+00 : f32
    %7 = vector.broadcast %cst_5 : f32 to vector<2x128xf32>
    %8 = arith.maximumf %6, %7 : vector<2x128xf32>
    %9 = arith.truncf %8 : vector<2x128xf32> to vector<2x128xbf16>
    %c0_6 = arith.constant 0 : index
    %c0_7 = arith.constant 0 : index
    %10 = vector.load %arg4[%c0_6, %c0_7] : memref<128x128xbf16, #tpu.memory_space<vmem>>, vector<128x128xbf16>
    %cst_8 = arith.constant dense<0.000000e+00> : vector<2x128xf32>
    %11 = tpu.matmul %9, %10, %cst_8 {dimension_numbers = #tpu.dot_dimension_numbers<[1], [0], [0], [1], [0, 0, 1, 1], [], []>} : vector<2x128xbf16>, vector<128x128xbf16>, vector<2x128xf32> -> vector<2x128xf32>
    %c0_9 = arith.constant 0 : index
    %c0_10 = arith.constant 0 : index
    %12 = vector.load %arg5[%c0_9, %c0_10] : memref<1x128xf32, #tpu.memory_space<vmem>>, vector<1x128xf32>
    %13 = vector.broadcast %12 : vector<1x128xf32> to vector<2x128xf32>
    %14 = arith.addf %11, %13 : vector<2x128xf32>
    %cst_11 = arith.constant 0.000000e+00 : f32
    %15 = vector.broadcast %cst_11 : f32 to vector<2x128xf32>
    %16 = arith.maximumf %14, %15 : vector<2x128xf32>
    %17 = arith.truncf %16 : vector<2x128xf32> to vector<2x128xbf16>
    %c0_12 = arith.constant 0 : index
    %c0_13 = arith.constant 0 : index
    %18 = vector.load %arg6[%c0_12, %c0_13] : memref<128x128xbf16, #tpu.memory_space<vmem>>, vector<128x128xbf16>
    %cst_14 = arith.constant dense<0.000000e+00> : vector<2x128xf32>
    %19 = tpu.matmul %17, %18, %cst_14 {dimension_numbers = #tpu.dot_dimension_numbers<[1], [0], [0], [1], [0, 0, 1, 1], [], []>} : vector<2x128xbf16>, vector<128x128xbf16>, vector<2x128xf32> -> vector<2x128xf32>
    %c0_15 = arith.constant 0 : index
    %c0_16 = arith.constant 0 : index
    %20 = vector.load %arg7[%c0_15, %c0_16] : memref<1x128xf32, #tpu.memory_space<vmem>>, vector<1x128xf32>
    %21 = vector.broadcast %20 : vector<1x128xf32> to vector<2x128xf32>
    %22 = arith.addf %19, %21 : vector<2x128xf32>
    %cst_17 = arith.constant 0.000000e+00 : f32
    %23 = vector.broadcast %cst_17 : f32 to vector<2x128xf32>
    %24 = arith.maximumf %22, %23 : vector<2x128xf32>
    %c0_18 = arith.constant 0 : index
    %c0_19 = arith.constant 0 : index
    %25 = vector.load %arg8[%c0_18, %c0_19] : memref<2x128xf32, #tpu.memory_space<vmem>>, vector<2x128xf32>
    tpu.vector_store %arg8[%c0_18, %c0_19], %24 {strides = array<i32>} : memref<2x128xf32, #tpu.memory_space<vmem>>, vector<2x128xf32>,
    return
  }
  func.func @transform_0(%arg0: i32) -> (i32, i32) {
    %c0_i32 = arith.constant 0 : i32
    %c0_i32_0 = arith.constant 0 : i32
    return %arg0, %c0_i32 : i32, i32
  }
  func.func @transform_1(%arg0: i32) -> (i32, i32) {
    %c0_i32 = arith.constant 0 : i32
    %c0_i32_0 = arith.constant 0 : i32
    %c0_i32_1 = arith.constant 0 : i32
    return %c0_i32, %c0_i32_0 : i32, i32
  }
  func.func @transform_2(%arg0: i32) -> (i32, i32) {
    %c0_i32 = arith.constant 0 : i32
    %c0_i32_0 = arith.constant 0 : i32
    %c0_i32_1 = arith.constant 0 : i32
    return %c0_i32, %c0_i32_0 : i32, i32
  }
  func.func @transform_3(%arg0: i32) -> (i32, i32) {
    %c0_i32 = arith.constant 0 : i32
    %c0_i32_0 = arith.constant 0 : i32
    %c0_i32_1 = arith.constant 0 : i32
    return %c0_i32, %c0_i32_0 : i32, i32
  }
  func.func @transform_4(%arg0: i32) -> (i32, i32) {
    %c0_i32 = arith.constant 0 : i32
    %c0_i32_0 = arith.constant 0 : i32
    %c0_i32_1 = arith.constant 0 : i32
    return %c0_i32, %c0_i32_0 : i32, i32
  }
  func.func @transform_5(%arg0: i32) -> (i32, i32) {
    %c0_i32 = arith.constant 0 : i32
    %c0_i32_0 = arith.constant 0 : i32
    %c0_i32_1 = arith.constant 0 : i32
    return %c0_i32, %c0_i32_0 : i32, i32
  }
  func.func @transform_6(%arg0: i32) -> (i32, i32) {
    %c0_i32 = arith.constant 0 : i32
    %c0_i32_0 = arith.constant 0 : i32
    %c0_i32_1 = arith.constant 0 : i32
    return %c0_i32, %c0_i32_0 : i32, i32
  }
  func.func @transform_7(%arg0: i32) -> (i32, i32) {
    %c0_i32 = arith.constant 0 : i32
    %c0_i32_0 = arith.constant 0 : i32
    return %arg0, %c0_i32 : i32, i32
  }
}

module attributes {stable_mosaic.version = 11 : i64} {
  func.func @generator_kernel(%arg0: i32, %arg1: memref<2x16xf32, #tpu.memory_space<vmem>>, %arg2: memref<16x128xbf16, #tpu.memory_space<vmem>>, %arg3: memref<1x128xf32, #tpu.memory_space<vmem>>, %arg4: memref<128x128xbf16, #tpu.memory_space<vmem>>, %arg5: memref<1x128xf32, #tpu.memory_space<vmem>>, %arg6: memref<128x128xbf16, #tpu.memory_space<vmem>>, %arg7: memref<1x128xf32, #tpu.memory_space<vmem>>, %arg8: memref<2x128xf32, #tpu.memory_space<vmem>>) attributes {dimension_semantics = [#tpu.dimension_semantics<parallel>], iteration_bounds = array<i64: 1>, scalar_prefetch = 0 : i64, scratch_operands = 0 : i64, tpu.core_type = #tpu.core_type<tc>, window_params = [{transform_indices = @transform_0, window_bounds = array<i64: 2, 16>}, {pipeline_mode = #tpu.pipeline_mode<synchronous>, transform_indices = @transform_1, window_bounds = array<i64: 16, 128>}, {pipeline_mode = #tpu.pipeline_mode<synchronous>, transform_indices = @transform_2, window_bounds = array<i64: 1, 128>}, {pipeline_mode = #tpu.pipeline_mode<synchronous>, transform_indices = @transform_3, window_bounds = array<i64: 128, 128>}, {pipeline_mode = #tpu.pipeline_mode<synchronous>, transform_indices = @transform_4, window_bounds = array<i64: 1, 128>}, {pipeline_mode = #tpu.pipeline_mode<synchronous>, transform_indices = @transform_5, window_bounds = array<i64: 128, 128>}, {pipeline_mode = #tpu.pipeline_mode<synchronous>, transform_indices = @transform_6, window_bounds = array<i64: 1, 128>}, {transform_indices = @transform_7, window_bounds = array<i64: 2, 128>}]} {
    %c0 = arith.constant 0 : index
    %c0_0 = arith.constant 0 : index
    %0 = vector.load %arg1[%c0, %c0_0] : memref<2x16xf32, #tpu.memory_space<vmem>>, vector<2x16xf32>
    %1 = arith.truncf %0 : vector<2x16xf32> to vector<2x16xbf16>
    %c0_1 = arith.constant 0 : index
    %c0_2 = arith.constant 0 : index
    %2 = vector.load %arg2[%c0_1, %c0_2] : memref<16x128xbf16, #tpu.memory_space<vmem>>, vector<16x128xbf16>
    %cst = arith.constant dense<0.000000e+00> : vector<2x128xf32>
    %3 = tpu.matmul %1, %2, %cst {dimension_numbers = #tpu.dot_dimension_numbers<[1], [0], [0], [1], [0, 0, 1, 1], [], []>} : vector<2x16xbf16>, vector<16x128xbf16>, vector<2x128xf32> -> vector<2x128xf32>
    %c0_3 = arith.constant 0 : index
    %c0_4 = arith.constant 0 : index
    %4 = vector.load %arg3[%c0_3, %c0_4] : memref<1x128xf32, #tpu.memory_space<vmem>>, vector<1x128xf32>
    %5 = vector.broadcast %4 : vector<1x128xf32> to vector<2x128xf32>
    %6 = arith.addf %3, %5 : vector<2x128xf32>
    %cst_5 = arith.constant 0.000000e+00 : f32
    %7 = vector.broadcast %cst_5 : f32 to vector<2x128xf32>
    %8 = arith.maximumf %6, %7 : vector<2x128xf32>
    %9 = arith.truncf %8 : vector<2x128xf32> to vector<2x128xbf16>
    %c0_6 = arith.constant 0 : index
    %c0_7 = arith.constant 0 : index
    %10 = vector.load %arg4[%c0_6, %c0_7] : memref<128x128xbf16, #tpu.memory_space<vmem>>, vector<128x128xbf16>
    %cst_8 = arith.constant dense<0.000000e+00> : vector<2x128xf32>
    %11 = tpu.matmul %9, %10, %cst_8 {dimension_numbers = #tpu.dot_dimension_numbers<[1], [0], [0], [1], [0, 0, 1, 1], [], []>} : vector<2x128xbf16>, vector<128x128xbf16>, vector<2x128xf32> -> vector<2x128xf32>
    %c0_9 = arith.constant 0 : index
    %c0_10 = arith.constant 0 : index
    %12 = vector.load %arg5[%c0_9, %c0_10] : memref<1x128xf32, #tpu.memory_space<vmem>>, vector<1x128xf32>
    %13 = vector.broadcast %12 : vector<1x128xf32> to vector<2x128xf32>
    %14 = arith.addf %11, %13 : vector<2x128xf32>
    %cst_11 = arith.constant 0.000000e+00 : f32
    %15 = vector.broadcast %cst_11 : f32 to vector<2x128xf32>
    %16 = arith.maximumf %14, %15 : vector<2x128xf32>
    %17 = arith.truncf %16 : vector<2x128xf32> to vector<2x128xbf16>
    %c0_12 = arith.constant 0 : index
    %c0_13 = arith.constant 0 : index
    %18 = vector.load %arg6[%c0_12, %c0_13] : memref<128x128xbf16, #tpu.memory_space<vmem>>, vector<128x128xbf16>
    %cst_14 = arith.constant dense<0.000000e+00> : vector<2x128xf32>
    %19 = tpu.matmul %17, %18, %cst_14 {dimension_numbers = #tpu.dot_dimension_numbers<[1], [0], [0], [1], [0, 0, 1, 1], [], []>} : vector<2x128xbf16>, vector<128x128xbf16>, vector<2x128xf32> -> vector<2x128xf32>
    %c0_15 = arith.constant 0 : index
    %c0_16 = arith.constant 0 : index
    %20 = vector.load %arg7[%c0_15, %c0_16] : memref<1x128xf32, #tpu.memory_space<vmem>>, vector<1x128xf32>
    %21 = vector.broadcast %20 : vector<1x128xf32> to vector<2x128xf32>
    %22 = arith.addf %19, %21 : vector<2x128xf32>
    %cst_17 = arith.constant 0.000000e+00 : f32
    %23 = vector.broadcast %cst_17 : f32 to vector<2x128xf32>
    %24 = arith.maximumf %22, %23 : vector<2x128xf32>
    %c0_18 = arith.constant 0 : index
    %c0_19 = arith.constant 0 : index
    %25 = vector.load %arg8[%c0_18, %c0_19] : memref<2x128xf32, #tpu.memory_space<vmem>>, vector<2x128xf32>
    tpu.vector_store %arg8[%c0_18, %c0_19], %24 {strides = array<i32>} : memref<2x128xf32, #tpu.memory_space<vmem>>, vector<2x128xf32>,
    return
  }
  func.func @transform_0(%arg0: i32) -> (i32, i32) {
    %c0_i32 = arith.constant 0 : i32
    %c0_i32_0 = arith.constant 0 : i32
    return %arg0, %c0_i32 : i32, i32
  }
  func.func @transform_1(%arg0: i32) -> (i32, i32) {
    %c0_i32 = arith.constant 0 : i32
    %c0_i32_0 = arith.constant 0 : i32
    %c0_i32_1 = arith.constant 0 : i32
    return %c0_i32, %c0_i32_0 : i32, i32
  }
  func.func @transform_2(%arg0: i32) -> (i32, i32) {
    %c0_i32 = arith.constant 0 : i32
    %c0_i32_0 = arith.constant 0 : i32
    %c0_i32_1 = arith.constant 0 : i32
    return %c0_i32, %c0_i32_0 : i32, i32
  }
  func.func @transform_3(%arg0: i32) -> (i32, i32) {
    %c0_i32 = arith.constant 0 : i32
    %c0_i32_0 = arith.constant 0 : i32
    %c0_i32_1 = arith.constant 0 : i32
    return %c0_i32, %c0_i32_0 : i32, i32
  }
  func.func @transform_4(%arg0: i32) -> (i32, i32) {
    %c0_i32 = arith.constant 0 : i32
    %c0_i32_0 = arith.constant 0 : i32
    %c0_i32_1 = arith.constant 0 : i32
    return %c0_i32, %c0_i32_0 : i32, i32
  }
  func.func @transform_5(%arg0: i32) -> (i32, i32) {
    %c0_i32 = arith.constant 0 : i32
    %c0_i32_0 = arith.constant 0 : i32
    %c0_i32_1 = arith.constant 0 : i32
    return %c0_i32, %c0_i32_0 : i32, i32
  }
  func.func @transform_6(%arg0: i32) -> (i32, i32) {
    %c0_i32 = arith.constant 0 : i32
    %c0_i32_0 = arith.constant 0 : i32
    %c0_i32_1 = arith.constant 0 : i32
    return %c0_i32, %c0_i32_0 : i32, i32
  }
  func.func @transform_7(%arg0: i32) -> (i32, i32) {
    %c0_i32 = arith.constant 0 : i32
    %c0_i32_0 = arith.constant 0 : i32
    return %arg0, %c0_i32 : i32, i32
  }
}

</mosaic_0001>

<bundles_post_ra>
// kernel: tpu_custom_call.1
= control target key start
LH: loop header
LB: loop body
LE: loop exit
PB: predicated region body
PF: predicated region fallthrough
CT: control target
= control target key end

     0   :  { %12 = vsyncpa [#allocation3], 0  ;;  %s602_s0 = inlined_call_operand.hbm [shape: f32[2,16], index: 0, kind: input, shape index: {}]   ;;  %s603_s1 = inlined_call_operand.hbm [shape: bf16[16,128], index: 1, kind: input, shape index: {}]   ;;  %s604_s2 = inlined_call_operand.vmem [shape: f32[1,128], index: 2, kind: input, shape index: {}]   ;;  %s605_s3 = inlined_call_operand.hbm [shape: bf16[128,128], index: 3, kind: input, shape index: {}]   ;;  %s606_s4 = inlined_call_operand.vmem [shape: f32[1,128], index: 4, kind: input, shape index: {}]   ;;  %s607_s5 = inlined_call_operand.hbm [shape: bf16[128,128], index: 5, kind: input, shape index: {}]   ;;  %s608_s6 = inlined_call_operand.vmem [shape: f32[1,128], index: 6, kind: input, shape index: {}]   ;;  %s609_s7 = inlined_call_operand.hbm [shape: f32[2,128], index: 7, kind: output, shape index: {}]  }
   0x1   :  { %13 = vsyncpa [#allocation6], 0 }
   0x2   :  { %14 = vsyncpa [#allocation9], 0  ;;  %s31_s26 = sshll.u32 %s603_s1, 4  ;;  %s32_s26 = int_to_ptr.hbm [resolvable:$true] %s31_s26 }
   0x3   :  { %15 = vsyncpa [#allocation4], 0  ;;  %s531_s27 = smov [#allocation5]   ;;  %s21_s8 = sshll.u32 %s602_s0, 4  ;;  %s22_s8 = int_to_ptr.hbm [resolvable:$true] %s21_s8 }
   0x4   :  { %s33_s28 = sshll.u32 %s531_s27, 4  ;;  %s532_s9 = smov 64   ;;  %s34_s28 = int_to_ptr.vmem [resolvable:$true] %s33_s28 }
   0x5   :  { %s533_s10 = smov 4   ;;  %s534_s11 = smov [#allocation2]  }
   0x6   :  { %39 = dma.hbm_to_vmem [thread:$0]  %s32_s26, 128, %s34_s28, [#allocation6], %s532_s9, %s532_s9, %s533_s10  }
   0x7   :  { %s23_s12 = sshll.u32 %s534_s11, 4  ;;  %s46_s15 = sshll.u32 %s605_s3, 4  ;;  %s24_s12 = int_to_ptr.vmem [resolvable:$true] %s23_s12  ;;  %s47_s15 = int_to_ptr.hbm [resolvable:$true] %s46_s15 }
   0x8   :  { %26 = dma.hbm_to_vmem [thread:$0]  %s22_s8, 32, %s24_s12, [#allocation3]  }
   0x9   :  { %s61_s17 = sshll.u32 %s607_s5, 4  ;;  %s535_s18 = smov [#allocation7]   ;;  %s62_s17 = int_to_ptr.hbm [resolvable:$true] %s61_s17 }
   0xa   :  { %s48_s19 = sshll.u32 %s535_s18, 4  ;;  %s536_s0 = smov [#allocation8]   ;;  %s49_s19 = int_to_ptr.vmem [resolvable:$true] %s48_s19 }
   0xb   :  { %54 = dma.hbm_to_vmem [thread:$0]  %s47_s15, 1024, %s49_s19, [#allocation6], %s532_s9, %s532_s9, %s533_s10  }
   0xc   :  { %s63_s20 = sshll.u32 %s536_s0, 4  ;;  %s64_s20 = int_to_ptr.vmem [resolvable:$true] %s63_s20 }
   0xd   :  { %69 = dma.hbm_to_vmem [thread:$0]  %s62_s17, 1024, %s64_s20, [#allocation9], %s532_s9, %s532_s9, %s533_s10  }
   0xe   :  { %523 = dma.done.wait [#allocation3], 32  }
   0xf   :  { %524 = vsyncadd [#allocation3], 4294967264 }
  0x10   :  { %525 = dma.done.wait [#allocation6], 1152  }
  0x11   :  { %526 = vsyncadd [#allocation6], 4294966144 }
  0x12   :  { %527 = dma.done.wait [#allocation9], 1024  }
  0x13   :  { %528 = vsyncadd [#allocation9], 4294966272  ;;  %v376_v0 = vld [vmem:[#allocation5] sm:$0xff]  ;;  %v89_v1 = vld [vmem:[#allocation2] sm:$0x3]  ;;  %vm103_vm0 = vcmask 130048  }
  0x14   :  { %v384_v2 = vld [vmem:[#allocation7 + $0x38] sm:$0xff]  ;;  %v90_v3 = vpack.c.bf16 %v89_v1, %v89_v1  ;;  %114 = vmatpush.bf16.msra.mxu0 %v376_v0  ;;  %v383_v4 = vld [vmem:[#allocation7 + $0x30] sm:$0xff]  ;;  %v382_v5 = vld [vmem:[#allocation7 + $0x28] sm:$0xff]  ;;  %s537_s24 = smov [#allocation10]   ;;  %s295_s28 = sshll.u32 %s609_s7, 4  ;;  %s296_s28 = int_to_ptr.hbm [resolvable:$true] %s295_s28 }
  0x15   :  { %190 = vmatpush.bf16.msra.mxu1 %v384_v2  ;;  %v381_v6 = vld [vmem:[#allocation7 + $0x20] sm:$0xff]  ;;  %v380_v7 = vld [vmem:[#allocation7 + $0x18] sm:$0xff]  ;;  %v379_v8 = vld [vmem:[#allocation7 + $0x10] sm:$0xff]  ;;  %s293_s25 = sshll.u32 %s537_s24, 4  ;;  %s294_s25 = int_to_ptr.vmem [resolvable:$true] %s293_s25 }
  0x16   :  { %v378_v9 = vld [vmem:[#allocation7 + $0x8] sm:$0xff]  ;;  %v377_v10 = vld [vmem:[#allocation7] sm:$0xff]  ;;  %v392_v11 = vld [vmem:[#allocation8 + $0x38] sm:$0xff] }
  0x17   :  { %311 = vmatmul.msk.bf16.vlgmr.msra.gmra.mxu0 %vm103_vm0, %v90_v3  ;;  %273 = vmatpush.bf16.msra.mxu2 %v392_v11  ;;  %v391_v12 = vld [vmem:[#allocation8 + $0x30] sm:$0xff]  ;;  %v390_v13 = vld [vmem:[#allocation8 + $0x28] sm:$0xff]  ;;  %v389_v14 = vld [vmem:[#allocation8 + $0x20] sm:$0xff] }
  0x18   :  { %v388_v15 = vld [vmem:[#allocation8 + $0x18] sm:$0xff]  ;;  %v387_v16 = vld [vmem:[#allocation8 + $0x10] sm:$0xff]  ;;  %v386_v23 = vld [vmem:[#allocation8 + $0x8] sm:$0xff] }
  0x19   :  { %191 = vmatpush.bf16.msra.mxu1 %v383_v4  ;;  %v400_v17 = vld [vmem:[%s604_s2] ss:$0 sm:$0xff]  ;;  %v385_v24 = vld [vmem:[#allocation8] sm:$0xff] }
  0x1a   :  { %v401_v25 = vld [vmem:[%s606_s4] ss:$0 sm:$0xff] }
  0x1b   :  { %274 = vmatpush.bf16.msra.mxu2 %v391_v12  ;;  %v402_v31 = vld [vmem:[%s608_s6] ss:$0 sm:$0xff] }
  0x1d   :  { %192 = vmatpush.bf16.msra.mxu1 %v382_v5 }
  0x1f   :  { %275 = vmatpush.bf16.msra.mxu2 %v390_v13 }
  0x21   :  { %193 = vmatpush.bf16.msra.mxu1 %v381_v6 }
  0x23   :  { %276 = vmatpush.bf16.msra.mxu2 %v389_v14 }
  0x25   :  { %194 = vmatpush.bf16.msra.mxu1 %v380_v7 }
  0x27   :  { %277 = vmatpush.bf16.msra.mxu2 %v388_v15 }
  0x29   :  { %195 = vmatpush.bf16.msra.mxu1 %v379_v8 }
  0x2b   :  { %278 = vmatpush.bf16.msra.mxu2 %v387_v16 }
  0x2d   :  { %196 = vmatpush.bf16.msra.mxu1 %v378_v9 }
  0x2f   :  { %279 = vmatpush.bf16.msra.mxu2 %v386_v23 }
  0x31   :  { %197 = vmatpush.bf16.msra.mxu1 %v377_v10 }
  0x33   :  { %280 = vmatpush.bf16.msra.mxu2 %v385_v24 }
  0x94   :  { %v116_v18 = vpop.f32.mrf.mxu0 }
  0x95   :  { %v117_v19 = vadd.f32 %v400_v17, %v116_v18 }
  0x97   :  { %v120_v20 = vmax.f32 %v117_v19, 0.0 }
  0x99   :  { %v121_v21 = vpack.c.bf16 %v120_v20, %v120_v20 }
  0x9b   :  { %198 = vmatmul.bf16.vlgmr.msra.gmra.mxu1 %v121_v21 }
  0x9c   :  { %v118_v22 = vpop.f32.mrf.mxu0 }
 0x118   :  { %v199_v26 = vpop.f32.mrf.mxu1 }
 0x119   :  { %v200_v27 = vadd.f32 %v401_v25, %v199_v26 }
 0x11b   :  { %v203_v28 = vmax.f32 %v200_v27, 0.0 }
 0x11d   :  { %v204_v29 = vpack.c.bf16 %v203_v28, %v203_v28 }
 0x11f   :  { %281 = vmatmul.bf16.vlgmr.msra.gmra.mxu2 %v204_v29 }
 0x120   :  { %v201_v30 = vpop.f32.mrf.mxu1 }
 0x1a2   :  { %v282_v32 = vpop.f32.mrf.mxu2 }
 0x1a3   :  { %v283_v33 = vadd.f32 %v402_v31, %v282_v32 }
 0x1a5   :  { %v286_v34 = vmax.f32 %v283_v33, 0.0 }
 0x1a7   :  { %287 = vst [vmem:[#allocation10] sm:$0x3] %v286_v34 }
 0x1a8   :  { %298 = dma.vmem_to_hbm [thread:$0]  %s294_s25, 32, %s296_s28, [#allocation4]  }
 0x1aa   :  { %v284_v35 = vpop.f32.mrf.mxu2 }
 0x1ab   :  { %529 = dma.done.wait [#allocation4], 32  }
 0x1ac   :  { %530 = vsyncadd [#allocation4], 4294967264 }
 0x1ad   :  { %303 = vsyncpa [#allocation3], 1 }
 0x1ae   :  { %304 = vsyncpa [#allocation6], 1 }
 0x1af   :  { %305 = vsyncpa [#allocation9], 1 }
 0x1b0   :  { %306 = vsyncpa [#allocation4], 1 }

// kernel: tpu_custom_call.1
= control target key start
LH: loop header
LB: loop body
LE: loop exit
PB: predicated region body
PF: predicated region fallthrough
CT: control target
= control target key end

     0   :  { %12 = vsyncpa [#allocation3], 0  ;;  %s602_s0 = inlined_call_operand.hbm [shape: f32[2,16], index: 0, kind: input, shape index: {}]   ;;  %s603_s1 = inlined_call_operand.hbm [shape: bf16[16,128], index: 1, kind: input, shape index: {}]   ;;  %s604_s2 = inlined_call_operand.vmem [shape: f32[1,128], index: 2, kind: input, shape index: {}]   ;;  %s605_s3 = inlined_call_operand.hbm [shape: bf16[128,128], index: 3, kind: input, shape index: {}]   ;;  %s606_s4 = inlined_call_operand.vmem [shape: f32[1,128], index: 4, kind: input, shape index: {}]   ;;  %s607_s5 = inlined_call_operand.hbm [shape: bf16[128,128], index: 5, kind: input, shape index: {}]   ;;  %s608_s6 = inlined_call_operand.vmem [shape: f32[1,128], index: 6, kind: input, shape index: {}]   ;;  %s609_s7 = inlined_call_operand.hbm [shape: f32[2,128], index: 7, kind: output, shape index: {}]  }
   0x1   :  { %13 = vsyncpa [#allocation6], 0 }
   0x2   :  { %14 = vsyncpa [#allocation9], 0  ;;  %s31_s26 = sshll.u32 %s603_s1, 4  ;;  %s32_s26 = int_to_ptr.hbm [resolvable:$true] %s31_s26 }
   0x3   :  { %15 = vsyncpa [#allocation4], 0  ;;  %s531_s27 = smov [#allocation5]   ;;  %s21_s8 = sshll.u32 %s602_s0, 4  ;;  %s22_s8 = int_to_ptr.hbm [resolvable:$true] %s21_s8 }
   0x4   :  { %s33_s28 = sshll.u32 %s531_s27, 4  ;;  %s532_s9 = smov 64   ;;  %s34_s28 = int_to_ptr.vmem [resolvable:$true] %s33_s28 }
   0x5   :  { %s533_s10 = smov 4   ;;  %s534_s11 = smov [#allocation2]  }
   0x6   :  { %39 = dma.hbm_to_vmem [thread:$0]  %s32_s26, 128, %s34_s28, [#allocation6], %s532_s9, %s532_s9, %s533_s10  }
   0x7   :  { %s23_s12 = sshll.u32 %s534_s11, 4  ;;  %s46_s15 = sshll.u32 %s605_s3, 4  ;;  %s24_s12 = int_to_ptr.vmem [resolvable:$true] %s23_s12  ;;  %s47_s15 = int_to_ptr.hbm [resolvable:$true] %s46_s15 }
   0x8   :  { %26 = dma.hbm_to_vmem [thread:$0]  %s22_s8, 32, %s24_s12, [#allocation3]  }
   0x9   :  { %s61_s17 = sshll.u32 %s607_s5, 4  ;;  %s535_s18 = smov [#allocation7]   ;;  %s62_s17 = int_to_ptr.hbm [resolvable:$true] %s61_s17 }
   0xa   :  { %s48_s19 = sshll.u32 %s535_s18, 4  ;;  %s536_s0 = smov [#allocation8]   ;;  %s49_s19 = int_to_ptr.vmem [resolvable:$true] %s48_s19 }
   0xb   :  { %54 = dma.hbm_to_vmem [thread:$0]  %s47_s15, 1024, %s49_s19, [#allocation6], %s532_s9, %s532_s9, %s533_s10  }
   0xc   :  { %s63_s20 = sshll.u32 %s536_s0, 4  ;;  %s64_s20 = int_to_ptr.vmem [resolvable:$true] %s63_s20 }
   0xd   :  { %69 = dma.hbm_to_vmem [thread:$0]  %s62_s17, 1024, %s64_s20, [#allocation9], %s532_s9, %s532_s9, %s533_s10  }
   0xe   :  { %523 = dma.done.wait [#allocation3], 32  }
   0xf   :  { %524 = vsyncadd [#allocation3], 4294967264 }
  0x10   :  { %525 = dma.done.wait [#allocation6], 1152  }
  0x11   :  { %526 = vsyncadd [#allocation6], 4294966144 }
  0x12   :  { %527 = dma.done.wait [#allocation9], 1024  }
  0x13   :  { %528 = vsyncadd [#allocation9], 4294966272  ;;  %v376_v0 = vld [vmem:[#allocation5] sm:$0xff]  ;;  %v89_v1 = vld [vmem:[#allocation2] sm:$0x3]  ;;  %vm103_vm0 = vcmask 130048  }
  0x14   :  { %v384_v2 = vld [vmem:[#allocation7 + $0x38] sm:$0xff]  ;;  %v90_v3 = vpack.c.bf16 %v89_v1, %v89_v1  ;;  %114 = vmatpush.bf16.msra.mxu0 %v376_v0  ;;  %v383_v4 = vld [vmem:[#allocation7 + $0x30] sm:$0xff]  ;;  %v382_v5 = vld [vmem:[#allocation7 + $0x28] sm:$0xff]  ;;  %s537_s24 = smov [#allocation10]   ;;  %s295_s28 = sshll.u32 %s609_s7, 4  ;;  %s296_s28 = int_to_ptr.hbm [resolvable:$true] %s295_s28 }
  0x15   :  { %190 = vmatpush.bf16.msra.mxu1 %v384_v2  ;;  %v381_v6 = vld [vmem:[#allocation7 + $0x20] sm:$0xff]  ;;  %v380_v7 = vld [vmem:[#allocation7 + $0x18] sm:$0xff]  ;;  %v379_v8 = vld [vmem:[#allocation7 + $0x10] sm:$0xff]  ;;  %s293_s25 = sshll.u32 %s537_s24, 4  ;;  %s294_s25 = int_to_ptr.vmem [resolvable:$true] %s293_s25 }
  0x16   :  { %v378_v9 = vld [vmem:[#allocation7 + $0x8] sm:$0xff]  ;;  %v377_v10 = vld [vmem:[#allocation7] sm:$0xff]  ;;  %v392_v11 = vld [vmem:[#allocation8 + $0x38] sm:$0xff] }
  0x17   :  { %311 = vmatmul.msk.bf16.vlgmr.msra.gmra.mxu0 %vm103_vm0, %v90_v3  ;;  %273 = vmatpush.bf16.msra.mxu2 %v392_v11  ;;  %v391_v12 = vld [vmem:[#allocation8 + $0x30] sm:$0xff]  ;;  %v390_v13 = vld [vmem:[#allocation8 + $0x28] sm:$0xff]  ;;  %v389_v14 = vld [vmem:[#allocation8 + $0x20] sm:$0xff] }
  0x18   :  { %v388_v15 = vld [vmem:[#allocation8 + $0x18] sm:$0xff]  ;;  %v387_v16 = vld [vmem:[#allocation8 + $0x10] sm:$0xff]  ;;  %v386_v23 = vld [vmem:[#allocation8 + $0x8] sm:$0xff] }
  0x19   :  { %191 = vmatpush.bf16.msra.mxu1 %v383_v4  ;;  %v400_v17 = vld [vmem:[%s604_s2] ss:$0 sm:$0xff]  ;;  %v385_v24 = vld [vmem:[#allocation8] sm:$0xff] }
  0x1a   :  { %v401_v25 = vld [vmem:[%s606_s4] ss:$0 sm:$0xff] }
  0x1b   :  { %274 = vmatpush.bf16.msra.mxu2 %v391_v12  ;;  %v402_v31 = vld [vmem:[%s608_s6] ss:$0 sm:$0xff] }
  0x1d   :  { %192 = vmatpush.bf16.msra.mxu1 %v382_v5 }
  0x1f   :  { %275 = vmatpush.bf16.msra.mxu2 %v390_v13 }
  0x21   :  { %193 = vmatpush.bf16.msra.mxu1 %v381_v6 }
  0x23   :  { %276 = vmatpush.bf16.msra.mxu2 %v389_v14 }
  0x25   :  { %194 = vmatpush.bf16.msra.mxu1 %v380_v7 }
  0x27   :  { %277 = vmatpush.bf16.msra.mxu2 %v388_v15 }
  0x29   :  { %195 = vmatpush.bf16.msra.mxu1 %v379_v8 }
  0x2b   :  { %278 = vmatpush.bf16.msra.mxu2 %v387_v16 }
  0x2d   :  { %196 = vmatpush.bf16.msra.mxu1 %v378_v9 }
  0x2f   :  { %279 = vmatpush.bf16.msra.mxu2 %v386_v23 }
  0x31   :  { %197 = vmatpush.bf16.msra.mxu1 %v377_v10 }
  0x33   :  { %280 = vmatpush.bf16.msra.mxu2 %v385_v24 }
  0x94   :  { %v116_v18 = vpop.f32.mrf.mxu0 }
  0x95   :  { %v117_v19 = vadd.f32 %v400_v17, %v116_v18 }
  0x97   :  { %v120_v20 = vmax.f32 %v117_v19, 0.0 }
  0x99   :  { %v121_v21 = vpack.c.bf16 %v120_v20, %v120_v20 }
  0x9b   :  { %198 = vmatmul.bf16.vlgmr.msra.gmra.mxu1 %v121_v21 }
  0x9c   :  { %v118_v22 = vpop.f32.mrf.mxu0 }
 0x118   :  { %v199_v26 = vpop.f32.mrf.mxu1 }
 0x119   :  { %v200_v27 = vadd.f32 %v401_v25, %v199_v26 }
 0x11b   :  { %v203_v28 = vmax.f32 %v200_v27, 0.0 }
 0x11d   :  { %v204_v29 = vpack.c.bf16 %v203_v28, %v203_v28 }
 0x11f   :  { %281 = vmatmul.bf16.vlgmr.msra.gmra.mxu2 %v204_v29 }
 0x120   :  { %v201_v30 = vpop.f32.mrf.mxu1 }
 0x1a2   :  { %v282_v32 = vpop.f32.mrf.mxu2 }
 0x1a3   :  { %v283_v33 = vadd.f32 %v402_v31, %v282_v32 }
 0x1a5   :  { %v286_v34 = vmax.f32 %v283_v33, 0.0 }
 0x1a7   :  { %287 = vst [vmem:[#allocation10] sm:$0x3] %v286_v34 }
 0x1a8   :  { %298 = dma.vmem_to_hbm [thread:$0]  %s294_s25, 32, %s296_s28, [#allocation4]  }
 0x1aa   :  { %v284_v35 = vpop.f32.mrf.mxu2 }
 0x1ab   :  { %529 = dma.done.wait [#allocation4], 32  }
 0x1ac   :  { %530 = vsyncadd [#allocation4], 4294967264 }
 0x1ad   :  { %303 = vsyncpa [#allocation3], 1 }
 0x1ae   :  { %304 = vsyncpa [#allocation6], 1 }
 0x1af   :  { %305 = vsyncpa [#allocation9], 1 }
 0x1b0   :  { %306 = vsyncpa [#allocation4], 1 }

</bundles_post_ra>
